<compile_context>
chip_gen: v7x
topology: tpu7x:2x2x1
jax: 0.10.0
libtpu: 0.0.40
codegen_flags: <defaults>
</compile_context>

<pallas_src>
import functools

import jax
import jax.numpy as jnp
from jax.experimental import pallas as pl
from jax.experimental.pallas import tpu as pltpu


def _round_up(x, m):
    return (x + m - 1) // m * m


# ----------------------------- Pallas kernel ------------------------------ #
def _patch_proj_kernel(p_ref, w_ref, b_ref, o_ref):
    # p_ref: (tm, K) patches (bf16); w_ref: (K, E) weight (bf16);
    # b_ref: (1, E) bias (f32); o_ref: (tm, E) output (f32).
    acc = jnp.dot(p_ref[...], w_ref[...], preferred_element_type=jnp.float32)
    o_ref[...] = (acc + b_ref[...]).astype(o_ref.dtype)


def _patch_proj(patches2d, w2d, bias2d, *, tm):
    M, K = patches2d.shape
    K2, E = w2d.shape
    assert K == K2 and bias2d.shape == (1, E)

    grid = (pl.cdiv(M, tm),)  # ragged last block handled (masked) by Pallas

    # VMEM footprint: 2x streamed patch tile + 2x output tile, 1x resident
    # weight/bias, plus slack for Mosaic internals.
    vmem_bytes = (2 * tm * K * patches2d.dtype.itemsize
                  + 1 * K * E * w2d.dtype.itemsize
                  + 1 * E * bias2d.dtype.itemsize
                  + 2 * tm * E * 4
                  + (6 << 20))
    vmem_bytes = int(min(max(vmem_bytes, 8 << 20), 32 << 20))

    cost = pl.CostEstimate(
        flops=2 * M * K * E,
        transcendentals=0,
        bytes_accessed=(M * K * patches2d.dtype.itemsize
                        + K * E * w2d.dtype.itemsize
                        + E * bias2d.dtype.itemsize
                        + M * E * 4))

    return pl.pallas_call(
        _patch_proj_kernel,
        out_shape=jax.ShapeDtypeStruct((M, E), jnp.float32),
        grid=grid,
        in_specs=[
            # Streamed patch tiles (auto double-buffered).
            pl.BlockSpec((tm, K), lambda i: (i, 0)),
            # Weight/bias never change block index -> single VMEM-resident copy.
            pl.BlockSpec((K, E), lambda i: (0, 0), pipeline_mode=pl.Buffered(1)),
            pl.BlockSpec((1, E), lambda i: (0, 0), pipeline_mode=pl.Buffered(1)),
        ],
        out_specs=pl.BlockSpec((tm, E), lambda i: (i, 0)),
        compiler_params=pltpu.CompilerParams(
            dimension_semantics=("parallel",),
            vmem_limit_bytes=vmem_bytes),
        cost_estimate=cost,
    )(patches2d, w2d, bias2d)


# ------------------------------- Module port ------------------------------ #
class PatchEmbedNew:
    """JAX/Pallas port of PatchEmbed_new (flexible image-to-patch embedding)."""

    _TM_MAX = 1024  # per-step patch-row tile cap; fits v5e/v6e/v7x VMEM

    def __init__(self, img_size=16, patch_size=8, in_chans=4, embed_dim=32,
                 stride=4, key=None, compute_dtype=jnp.bfloat16):
        to2 = lambda v: (v, v) if isinstance(v, int) else tuple(v)
        self.img_size = to2(img_size)
        self.patch_size = to2(patch_size)
        self.stride = to2(stride)
        self.in_chans = in_chans
        self.embed_dim = embed_dim
        self.compute_dtype = compute_dtype

        ph, pw = self.patch_size
        sh, sw = self.stride
        H, W = self.img_size
        h = (H - ph) // sh + 1
        w = (W - pw) // sw + 1
        self.patch_hw = (h, w)
        self.num_patches = h * w

        # Deterministic synthetic parameters (Conv2d weight/bias shapes).
        key = jax.random.PRNGKey(0) if key is None else key
        kw_, kb_ = jax.random.split(key)
        fan_in = in_chans * ph * pw
        bound = 1.0 / (fan_in ** 0.5)
        # weight: (embed_dim, in_chans, ph, pw); bias: (embed_dim,)
        self.weight = jax.random.uniform(
            kw_, (embed_dim, in_chans, ph, pw), jnp.float32, -bound, bound)
        self.bias = jax.random.uniform(
            kb_, (embed_dim,), jnp.float32, -bound, bound)

        # GEMM operands built once.  No K/N zero-padding: full-extent blocks
        # are legal regardless of 128-alignment, and padding would cost an
        # extra HBM pass on a memory-bound op.  Precision contract: operands
        # are bf16 on the MXU with f32 accumulation (differs slightly from
        # PyTorch's f32 Conv2d).
        self.K = fan_in
        self.w2d = self.weight.reshape(embed_dim, self.K).T.astype(compute_dtype)  # (K, E)
        self.b2d = self.bias.reshape(1, embed_dim).astype(jnp.float32)             # (1, E)

    def _pick_tm(self, M):
        # Aim for >= 2 grid steps so ("parallel",) shards across v7x's two
        # TensorCores; round to 16 (bf16 sublane packing) or 256 (MXU-sized).
        tm = -(-M // 2)
        tm = _round_up(tm, 256) if tm >= 256 else _round_up(tm, 16)
        return max(16, min(self._TM_MAX, tm))

    @functools.partial(jax.jit, static_argnums=0)
    def __call__(self, x):
        B = x.shape[0]
        L = self.num_patches

        # im2col via identity-kernel patch extraction (single fused XLA op,
        # bf16 to halve HBM traffic).  Output feature order is (c, kh, kw),
        # matching the OIHW weight flatten above.
        # TODO(synk): fuse this strided patch extraction into the Pallas
        # kernel (memory_space=pl.ANY + manual strided DMA) to avoid the
        # (ph*pw)/(sh*sw)x expanded patch matrix in HBM when stride < patch.
        patches = jax.lax.conv_general_dilated_patches(
            x.astype(self.compute_dtype),
            filter_shape=self.patch_size, window_strides=self.stride,
            padding="VALID", dimension_numbers=("NCHW", "OIHW", "NHWC"))
        patches2d = patches.reshape(B * L, self.K)

        M = B * L
        out2d = _patch_proj(patches2d, self.w2d, self.b2d, tm=self._pick_tm(M))
        return out2d.reshape(B, L, self.embed_dim)  # == x.flatten(2).transpose(1, 2)


# --------------------------------- main ----------------------------------- #
def _reference(embed, x):
    """f32 XLA conv on bf16-rounded operands, then flatten(2).transpose(1,2)."""
    xr = x.astype(embed.compute_dtype).astype(jnp.float32)
    wr = embed.weight.astype(embed.compute_dtype).astype(jnp.float32)
    ref = jax.lax.conv_general_dilated(
        xr, wr, window_strides=embed.stride, padding="VALID",
        dimension_numbers=("NCHW", "OIHW", "NCHW"),
        precision=jax.lax.Precision.HIGHEST)
    ref = ref + embed.bias[None, :, None, None]
    B = x.shape[0]
    return ref.reshape(B, embed.embed_dim, -1).transpose(0, 2, 1)


if __name__ == "__main__":
    # Case 1: B=2, C=4, 16x16 image, 8x8 patch, stride 4, embed_dim=32 -> L=9.
    embed1 = PatchEmbedNew(img_size=16, patch_size=8, in_chans=4, embed_dim=32,
                           stride=4, key=jax.random.PRNGKey(42))
    x1 = jax.random.normal(jax.random.PRNGKey(0), (2, 4, 16, 16), jnp.float32)
    out1 = jax.block_until_ready(embed1(x1))
    assert out1.shape == (2, embed1.num_patches, 32), out1.shape
    ref1 = _reference(embed1, x1)
    err1 = float(jnp.max(jnp.abs(out1 - ref1)))
    assert jnp.allclose(out1, ref1, atol=1e-2, rtol=1e-2), err1

    # Case 2: non-square patch/stride, odd channel count (feature-order check).
    embed2 = PatchEmbedNew(img_size=(16, 12), patch_size=(8, 4), in_chans=3,
                           embed_dim=48, stride=(4, 2),
                           key=jax.random.PRNGKey(7))
    x2 = jax.random.normal(jax.random.PRNGKey(1), (2, 3, 16, 12), jnp.float32)
    out2 = jax.block_until_ready(embed2(x2))
    assert out2.shape == (2, embed2.num_patches, 48), out2.shape
    ref2 = _reference(embed2, x2)
    err2 = float(jnp.max(jnp.abs(out2 - ref2)))
    assert jnp.allclose(out2, ref2, atol=1e-2, rtol=1e-2), err2

    print("KERNEL_OK")
</pallas_src>

<mosaic_0001>
module attributes {stable_mosaic.version = 11 : i64} {
  func.func @_patch_proj_kernel(%arg0: i32, %arg1: memref<16x256xbf16, #tpu.memory_space<vmem>>, %arg2: memref<256x32xbf16, #tpu.memory_space<vmem>>, %arg3: memref<1x32xf32, #tpu.memory_space<vmem>>, %arg4: memref<16x32xf32, #tpu.memory_space<vmem>>) attributes {dimension_semantics = [#tpu.dimension_semantics<parallel>], iteration_bounds = array<i64: 2>, scalar_prefetch = 0 : i64, scratch_operands = 0 : i64, tpu.core_type = #tpu.core_type<tc>, window_params = [{transform_indices = @transform_0, window_bounds = array<i64: 16, 256>}, {pipeline_mode = #tpu.pipeline_mode<synchronous>, transform_indices = @transform_1, window_bounds = array<i64: 256, 32>}, {pipeline_mode = #tpu.pipeline_mode<synchronous>, transform_indices = @transform_2, window_bounds = array<i64: 1, 32>}, {transform_indices = @transform_3, window_bounds = array<i64: 16, 32>}]} {
    %c0 = arith.constant 0 : index
    %c0_0 = arith.constant 0 : index
    %0 = vector.load %arg1[%c0, %c0_0] : memref<16x256xbf16, #tpu.memory_space<vmem>>, vector<16x256xbf16>
    %c0_1 = arith.constant 0 : index
    %c0_2 = arith.constant 0 : index
    %1 = vector.load %arg2[%c0_1, %c0_2] : memref<256x32xbf16, #tpu.memory_space<vmem>>, vector<256x32xbf16>
    %cst = arith.constant dense<0.000000e+00> : vector<16x32xf32>
    %2 = tpu.matmul %0, %1, %cst {dimension_numbers = #tpu.dot_dimension_numbers<[1], [0], [0], [1], [0, 0, 1, 1], [], []>} : vector<16x256xbf16>, vector<256x32xbf16>, vector<16x32xf32> -> vector<16x32xf32>
    %c0_3 = arith.constant 0 : index
    %c0_4 = arith.constant 0 : index
    %3 = vector.load %arg3[%c0_3, %c0_4] : memref<1x32xf32, #tpu.memory_space<vmem>>, vector<1x32xf32>
    %4 = vector.broadcast %3 : vector<1x32xf32> to vector<16x32xf32>
    %5 = arith.addf %2, %4 : vector<16x32xf32>
    %c0_5 = arith.constant 0 : index
    %c0_6 = arith.constant 0 : index
    %6 = vector.load %arg4[%c0_5, %c0_6] : memref<16x32xf32, #tpu.memory_space<vmem>>, vector<16x32xf32>
    tpu.vector_store %arg4[%c0_5, %c0_6], %5 {strides = array<i32>} : memref<16x32xf32, #tpu.memory_space<vmem>>, vector<16x32xf32>,
    return
  }
  func.func @transform_0(%arg0: i32) -> (i32, i32) {
    %c0_i32 = arith.constant 0 : i32
    %c0_i32_0 = arith.constant 0 : i32
    return %arg0, %c0_i32 : i32, i32
  }
  func.func @transform_1(%arg0: i32) -> (i32, i32) {
    %c0_i32 = arith.constant 0 : i32
    %c0_i32_0 = arith.constant 0 : i32
    %c0_i32_1 = arith.constant 0 : i32
    return %c0_i32, %c0_i32_0 : i32, i32
  }
  func.func @transform_2(%arg0: i32) -> (i32, i32) {
    %c0_i32 = arith.constant 0 : i32
    %c0_i32_0 = arith.constant 0 : i32
    %c0_i32_1 = arith.constant 0 : i32
    return %c0_i32, %c0_i32_0 : i32, i32
  }
  func.func @transform_3(%arg0: i32) -> (i32, i32) {
    %c0_i32 = arith.constant 0 : i32
    %c0_i32_0 = arith.constant 0 : i32
    return %arg0, %c0_i32 : i32, i32
  }
}

</mosaic_0001>

<bundles_post_ra>
// kernel: a_call__.1
= control target key start
LH: loop header
LB: loop body
LE: loop exit
PB: predicated region body
PF: predicated region fallthrough
CT: control target
= control target key end

     0   :  { %s896_s12 = smov 0   ;;  %s898_s13 = smov 0   ;;  %s1030_s0 = inlined_call_operand.vmem [shape: bf16[18,256], index: 0, kind: input, shape index: {}]   ;;  %s1031_s1 = inlined_call_operand.vmem [shape: bf16[256,32], index: 1, kind: input, shape index: {}]   ;;  %s1032_s2 = inlined_call_operand.vmem [shape: f32[1,32], index: 2, kind: input, shape index: {}]   ;;  %s1033_s3 = inlined_call_operand.vmem [shape: f32[18,32], index: 3, kind: output, shape index: {}]  }
   0x1   :  { %s900_s14 = smov 0  }
   0x2 LB: > { %s909_s15 = sadd.s32 4294967295, %s842_s14   ;;  %s911_s16 = sadd.s32 1, %s842_s14   ;;  %s842_s14 = sphi %s900_s14, %s1037_s14   ;;  %s838_s13 = sphi %s898_s13, %s1036_s13   ;;  %s834_s12 = sphi %s896_s12, %s1035_s12  }
   0x3   : > { %s85_s17 = ssub.s32 %s842_s14, %s911_s16  ;;  %s88_s18 = sadd.s32 1, %s838_s13 }
   0x4   : > { %p86_p0 = scmp.eq.s32.totalorder %s85_s17, 0  ;;  %p98_p1 = scmp.ne.s32.totalorder %s838_s13, %s834_s12 }
   0x5   : > { %p99_p2 = scmp.eq.s32.totalorder %s909_s15, 1  ;;  %p614_p3 = scmp.ge.s32.totalorder %s842_s14, 1 }
   0x6   : > { %s919_s19 = scalar_select %p86_p0, %s838_s13, %s88_s18  }
   0x7   : > { %p921_p4 = por %p99_p2, %p98_p1  ;;  %p149_p5 = scmp.lt.s32.totalorder %s842_s14, 3 }
   0x9   : > { %p150_p6 = pnand %p614_p3, %p149_p5 }
   0xa   : > { %v769_v0 = vld [vmem:[%s1031_s1 + $0x40] sm:$0xff] (!%p150_p6)   ;;  %s929_s23 = sshll.u32 (!%p150_p6), %s909_s15, 1  ;;  %v771_v2 = vld [vmem:[%s1031_s1 + $0x48] sm:$0xff] (!%p150_p6)   ;;  %v773_v4 = vld [vmem:[%s1031_s1 + $0x50] sm:$0xff] (!%p150_p6)   ;;  %vm389_vm0 = vcmask (!%p150_p6), 261120  }
   0xb   : > { %153 = sbr.rel (%p150_p6) target bundleno = 312 (0x138), region = 32  ;;  %v770_v1 = vld [vmem:[%s1031_s1] sm:$0xff] (!%p150_p6)   ;;  %659 = vmatprep.subr.bf16.mxu0 (!%p150_p6), %v769_v0  ;;  %v772_v3 = vld [vmem:[%s1031_s1 + $0x8] sm:$0xff] (!%p150_p6)   ;;  %p184_p7 = scmp.lt.s32.totalorder (!%p150_p6), %s929_s23, 2  ;;  %v774_v5 = vld [vmem:[%s1031_s1 + $0x10] sm:$0xff] (!%p150_p6)  }
   0xc   : > { %660 = vmatpush3.bf16.msra.mxu0 (!%p150_p6), %v770_v1  ;;  %v775_v6 = vld [vmem:[%s1031_s1 + $0x58] sm:$0xff] (!%p150_p6)   ;;  %v777_v8 = vld [vmem:[%s1031_s1 + $0x60] sm:$0xff] (!%p150_p6)   ;;  %v779_v10 = vld [vmem:[%s1031_s1 + $0x68] sm:$0xff] (!%p150_p6)  }
   0xd   : > { %661 = vmatprep.subr.bf16.mxu0 (!%p150_p6), %v771_v2  ;;  %v776_v7 = vld [vmem:[%s1031_s1 + $0x18] sm:$0xff] (!%p150_p6)   ;;  %v778_v9 = vld [vmem:[%s1031_s1 + $0x20] sm:$0xff] (!%p150_p6)   ;;  %v780_v12 = vld [vmem:[%s1031_s1 + $0x28] sm:$0xff] (!%p150_p6)  }
   0xe   : > { %v781_v13 = vld [vmem:[%s1031_s1 + $0x70] sm:$0xff] (!%p150_p6)   ;;  %v783_v15 = vld [vmem:[%s1031_s1 + $0x78] sm:$0xff] (!%p150_p6)   ;;  %v619_v19 = vld [vmem:[%s1032_s2] ss:$0 sm:$0xff] (!%p150_p6) }
   0xf   : > { %v782_v14 = vld [vmem:[%s1031_s1 + $0x30] sm:$0xff] (!%p150_p6)   ;;  %v784_v16 = vld [vmem:[%s1031_s1 + $0x38] sm:$0xff] (!%p150_p6)  }
  0x10   : > { %662 = vmatpush3.bf16.msra.mxu0 (!%p150_p6), %v772_v3 }
  0x11   : > { %663 = vmatprep.subr.bf16.mxu0 (!%p150_p6), %v773_v4 }
  0x12   : > { %s185_s7 = scalar_select %p184_p7, %s929_s23, 2 }
  0x14   : > { %664 = vmatpush3.bf16.msra.mxu0 %v774_v5  ;;  %s655_s14 = sshll.u32 %s185_s7, 3 }
  0x15   : > { %665 = vmatprep.subr.bf16.mxu0 %v775_v6  ;;  %s188_s24 = scalar_lea.vmem %s1030_s0, %s655_s14  ;;  %s175_s14 = sand.u32 1, %s834_s12  }
  0x16   : > { %v787_v11 = vld [vmem:[%s188_s24 + $0x4] ss:$8 sps:$4 sm:$0xff]   ;;  %v785_v17 = vld [vmem:[%s188_s24] ss:$8 sps:$4 sm:$0xff]   ;;  %s615_s17 = sshll.u32 %s175_s14, 4  ;;  %s400_s12 = ssub.s32 (%p921_p4), 3, %s929_s23 }
  0x17   : > { %380 = vmatprep.mubr.bf16.mxu0 %v787_v11  ;;  %s985_s22 = scalar_lea.vmem [#allocation2], %s615_s17   ;;  %s656_s24 = sshll.u32 (%p921_p4), %s909_s15, 4 }
  0x18   : > { %666 = vmatpush3.bf16.msra.mxu0 %v776_v7  ;;  %p401_p8 = scmp.lt.s32.totalorder (%p921_p4), %s400_s12, 2  ;;  %s996_s27 = scalar_lea.vmem (%p921_p4), %s1033_s3, %s656_s24  }
  0x19   : > { %667 = vmatprep.subr.bf16.mxu0 %v777_v8 }
  0x1c   : > { %668 = vmatpush3.bf16.msra.mxu0 %v778_v9 }
  0x1d   : > { %669 = vmatprep.subr.bf16.mxu0 %v779_v10 }
  0x20   : > { %670 = vmatpush3.bf16.msra.mxu0 %v780_v12 }
  0x21   : > { %671 = vmatprep.subr.bf16.mxu0 %v781_v13 }
  0x24   : > { %672 = vmatpush3.bf16.msra.mxu0 %v782_v14 }
  0x25   : > { %673 = vmatprep.subr.bf16.mxu0 %v783_v15 }
  0x28   : > { %674 = vmatpush3.bf16.msra.mxu0 %v784_v16 }
  0x2b   : > { %381 = vmatmul.mubr.bf16.vlgmr.msra.gmra.mrb[0].mxu0 %v785_v17 }
  0xfe   : > { %v675_v18 = vpop.f32.mrb[0].mxu0 }
  0xff   : > { %v676_v20 = vpop.f32.mrb[1].mxu0 }
 0x100   : > { %v677_v21 = vadd.f32 %v676_v20, %v675_v18  ;;  %v678_v22 = vpop.f32.mrb[2].mxu0  ;;  %398 = sbr.rel (!%p921_p4) target bundleno = 312 (0x138), region = 36 }
 0x101   : > { %v679_v23 = vpop.f32.mrb[3].mxu0 }
 0x102   : > { %v383_v24 = vadd.f32 %v677_v21, %v619_v19  ;;  %v680_v25 = vadd.f32 %v679_v23, %v678_v22 }
 0x104   : > { %390 = vst.msk [vmem:[%s985_s22] sm:$0xff] %vm389_vm0, %v383_v24  ;;  %v386_v26 = vadd.f32 %v680_v25, %v619_v19 }
 0x106   : > { %391 = vst.msk [vmem:[%s985_s22 + $0x8] sm:$0xff] %vm389_vm0, %v386_v26 }
 0x107   : > { %s1039_s12 = smov (!%p401_p8, %s400_s12), 2 }
 0x108   : > { %s640_s28 = sshll.u32 %s1039_s12, 7 }
 0x109   : > { %p643_p9 = scmp.eq.s32.totalorder %s640_s28, 0 }
 0x10a   : > { %s1002_s29 = sshrl.u32 (!%p643_p9), %s1039_s12, 1 }
 0x10b   : > { %409 = sbr.rel (%p643_p9) target bundleno = 312 (0x138), region = 40  ;;  %p644_p10 = scmp.le.s32.totalorder (!%p643_p9), %s1002_s29, 0 }
 0x112   : > { %567 = sbr.rel (%p644_p10) target bundleno = 291 (0x123), region = 116  ;;  %s844_s15 = smov (!%p644_p10), %s996_s27  }
 0x113   : > { %s848_s20 = smov (!%p644_p10), %s985_s22   ;;  %s852_s23 = smov (!%p644_p10), 0  }
 0x114   : > { %s856_s30 = smov (!%p644_p10), 0  }
 0x119 LB: >> { %v473_v27 = vld [vmem:[%s850_s20] sm:$0xff]  ;;  %v475_v28 = vld [vmem:[%s850_s20 + $0x8] sm:$0xff]  ;;  %s477_s4 = sadd.s32 1, %s854_s23  ;;  %s467_s30 = sadd.s32 1, %s858_s30   ;;  %s858_s30 = sphi %s856_s30, %s467_s30   ;;  %s854_s23 = sphi %s852_s23, %s853_s23   ;;  %s850_s20 = sphi %s848_s20, %s482_s20   ;;  %s846_s15 = sphi %s844_s15, %s483_s15  }
 0x11a   : >> { %474 = vst [vmem:[%s846_s15] sm:$0xff] %v473_v27  ;;  %476 = vst [vmem:[%s846_s15 + $0x8] sm:$0xff] %v475_v28  ;;  %p478_p11 = scmp.ge.s32.totalorder %s477_s4, %s1002_s29  ;;  %p466_p12 = scmp.ge.s32.totalorder %s467_s30, %s1002_s29 }
 0x11c   : >> { %s1041_s4 = smov (%p478_p11, %s477_s4), 0  ;;  %469 = sbr.rel (!%p466_p12) target bundleno = 281 (0x119), region = 122 }
 0x11d   : >> { %s645_s5 = sshll.u32 %s1041_s4, 4  ;;  %s853_s23 = smov %s1041_s4  }
 0x11e   : >> { %s482_s20 = scalar_lea.vmem %s985_s22, %s645_s5 [#allocation2]   ;;  %s483_s15 = scalar_lea.vmem %s996_s27, %s645_s5  }
 0x123 PF: > { %s1012_s6 = sand.u32 1, %s1039_s12   ;;  %s657_s7 = sshll.u32 %s1002_s29, 4 }
 0x124   : > { %s488_s8 = scalar_lea.vmem %s985_s22, %s657_s7 [#allocation2]   ;;  %s490_s9 = scalar_lea.vmem %s996_s27, %s657_s7  }
 0x125   : > { %p650_p13 = scmp.le.s32.totalorder %s1012_s6, 0 }
 0x126   : > { %s860_s10 = smov (!%p650_p13), %s490_s9   ;;  %s864_s11 = smov (!%p650_p13), %s488_s8  }
 0x127   : > { %581 = sbr.rel (%p650_p13) target bundleno = 312 (0x138), region = 127  ;;  %s868_s14 = smov (!%p650_p13), 0  }
 0x128   : > { %s872_s17 = smov (!%p650_p13), 0  }
 0x12e LB: >> { %v500_v29 = vld [vmem:[%s866_s11] sm:$0xff]  ;;  %s502_s18 = sadd.s32 1, %s870_s14  ;;  %s494_s17 = sadd.s32 1, %s874_s17   ;;  %s874_s17 = sphi %s872_s17, %s494_s17   ;;  %s870_s14 = sphi %s868_s14, %s869_s14   ;;  %s866_s11 = sphi %s864_s11, %s507_s11   ;;  %s862_s10 = sphi %s860_s10, %s508_s10  }
 0x12f   : >> { %501 = vst [vmem:[%s862_s10] sm:$0xff] %v500_v29  ;;  %p503_p0 = scmp.ge.s32.totalorder %s502_s18, %s1012_s6  ;;  %p493_p1 = scmp.ge.s32.totalorder %s494_s17, %s1012_s6 }
 0x131   : >> { %s1043_s18 = smov (%p503_p0, %s502_s18), 0  ;;  %496 = sbr.rel (!%p493_p1) target bundleno = 302 (0x12e), region = 133 }
 0x132   : >> { %s651_s21 = sshll.u32 %s1043_s18, 3  ;;  %s869_s14 = smov %s1043_s18  }
 0x133   : >> { %s507_s11 = scalar_lea.vmem %s488_s8, %s651_s21 [#allocation2]   ;;  %s508_s10 = scalar_lea.vmem %s490_s9, %s651_s21  }
 0x138 PF: > { %p10_p2 = scmp.ge.s32.totalorder %s911_s16, 4   ;;  %s1035_s12 = smov %s838_s13 }
 0x139   : > { %s1036_s13 = smov %s919_s19  ;;  %s1037_s14 = smov %s911_s16 }
 0x13a   :  { %12 = sbr.rel (!%p10_p2) target bundleno = 2 (0x2), region = 144 }

</bundles_post_ra>
